<compile_context>
chip_gen: v7x
topology: tpu7x:2x2x1
jax: 0.10.0
libtpu: 0.0.40
codegen_flags: <defaults>
</compile_context>

<pallas_src>
import functools
import math

import jax
import jax.numpy as jnp
from jax import lax
from jax.experimental import pallas as pl
from jax.experimental.pallas import tpu as pltpu


def _supcon_tile_kernel(rows_ref, cols_ref, o_ref, denom_acc, pos_acc, *,
                        max_logit: float, half_tiles: int, use_bf16: bool):
    # rows_ref: (T, D) tile of the scaled projections for row tile i.
    # cols_ref: (T, D) tile of the scaled projections for column tile j (streamed).
    # o_ref:    (1, 1, T) per-row loss terms for row tile i (written at the last j).
    # denom_acc, pos_acc: (1, T) f32 VMEM accumulators (rows live on lanes).
    i = pl.program_id(0)
    j = pl.program_id(1)
    num_tiles = 2 * half_tiles

    @pl.when(j == 0)
    def _init():
        denom_acc[...] = jnp.zeros_like(denom_acc)
        pos_acc[...] = jnp.zeros_like(pos_acc)

    rows = rows_ref[...]
    cols = cols_ref[...]
    if use_bf16:
        rows = rows.astype(jnp.bfloat16)
        cols = cols.astype(jnp.bfloat16)

    # sim_t[c, r] = <p[col c], p[row r]> / t   (temperature already folded into the
    # operands; contracting the last dim of both operands feeds the MXU directly).
    sim_t = lax.dot_general(
        cols, rows,
        dimension_numbers=(((1,), (1,)), ((), ())),
        preferred_element_type=jnp.float32,
    )
    # Global max of sim/t is exactly 1/t for L2-normalized features.
    sim_t = sim_t - max_logit

    cc = lax.broadcasted_iota(jnp.int32, sim_t.shape, 0)   # within-tile column index
    rr = lax.broadcasted_iota(jnp.int32, sim_t.shape, 1)   # within-tile row index
    on_diag = cc == rr

    e = jnp.exp(sim_t)
    # Drop the self-similarity (global diagonal) from the denominator; it only occurs
    # on the self tile (j == i), and tiles are diagonal-aligned because T | B.
    e = jnp.where(jnp.logical_and(on_diag, j == i), 0.0, e)
    denom_acc[...] += jnp.sum(e, axis=0, keepdims=True)          # (1, T)

    # The single positive of row r is column (r + B) mod 2B; with T | B that lands on
    # this tile's diagonal exactly when j is the "partner" column tile.
    @pl.when(j == (i + half_tiles) % num_tiles)
    def _grab_positive():
        pos_acc[...] = jnp.sum(jnp.where(on_diag, sim_t, 0.0), axis=0, keepdims=True)

    @pl.when(j == num_tiles - 1)
    def _finalize():
        # pos_count == 1 in the default branch, so out_mode=True and out_mode=False
        # both reduce to -(pos_logit - log(denom)) per row.
        per_row = pos_acc[...] - jnp.log(denom_acc[...])          # (1, T)
        o_ref[...] = per_row.reshape(o_ref.shape)


def _pick_tile(batch_size: int) -> int:
    for t in (512, 256, 128, 64, 32, 16, 8):
        if batch_size % t == 0:
            return t
    # TODO(synk): pad the batch for batch sizes that are not a multiple of 8.
    raise ValueError(f"batch size must be a multiple of 8, got {batch_size}")


def supcon_loss2(proj_feat1, proj_feat2, *, temperature: float = 0.07,
                 out_mode: bool = True, use_bf16: bool = False):
    """Pallas implementation of SupConLoss2.forward (target=None, mask=None branch).

    Features must be L2-normalized along dim 1 (the PyTorch module asserts this); the
    kernel relies on it to use the constant 1/t as the global max shift.  In the
    default branch pos_count == 1, so out_mode=True and out_mode=False give the same
    value; `out_mode` is kept only for API parity.
    """
    # TODO(synk): target=/mask= supervised-mask branches of the module are not implemented.
    del out_mode  # identical in the default-mask branch (pos_count == 1)
    assert proj_feat1.shape == proj_feat2.shape, (proj_feat1.shape, proj_feat2.shape)
    batch_size, dim = proj_feat1.shape
    n = 2 * batch_size

    tile = _pick_tile(batch_size)
    num_tiles = n // tile
    half_tiles = batch_size // tile

    # Fold the temperature into the operands: (p/sqrt(t)) @ (p/sqrt(t))^T == (p@p^T)/t.
    # The scale fuses with the concatenate (single XLA producer of the kernel input).
    scale = jnp.float32(1.0 / math.sqrt(temperature))
    projections = jnp.concatenate([proj_feat1, proj_feat2], axis=0).astype(jnp.float32) * scale

    kernel = functools.partial(
        _supcon_tile_kernel,
        max_logit=float(1.0 / temperature),
        half_tiles=half_tiles,
        use_bf16=use_bf16,
    )

    per_row = pl.pallas_call(
        kernel,
        out_shape=jax.ShapeDtypeStruct((num_tiles, 1, tile), jnp.float32),
        grid_spec=pltpu.PrefetchScalarGridSpec(
            num_scalar_prefetch=0,
            grid=(num_tiles, num_tiles),
            in_specs=[
                pl.BlockSpec((tile, dim), lambda i, j: (i, 0)),   # row tile (resident per i)
                pl.BlockSpec((tile, dim), lambda i, j: (j, 0)),   # column tile (streamed over j)
            ],
            out_specs=pl.BlockSpec((1, 1, tile), lambda i, j: (i, 0, 0)),
            scratch_shapes=[
                pltpu.VMEM((1, tile), jnp.float32),   # per-row denominator accumulator
                pltpu.VMEM((1, tile), jnp.float32),   # per-row positive logit
            ],
        ),
        compiler_params=pltpu.CompilerParams(
            dimension_semantics=("parallel", "arbitrary")),
    )(projections, projections)

    return -jnp.mean(per_row.reshape(n))


def _reference_loss(f1, f2, temperature=0.07, out_mode=True):
    # Pure-JAX reference mirroring the PyTorch forward (default mask branch).
    b = f1.shape[0]
    p = jnp.concatenate([f1, f2], axis=0)
    sim = p @ p.T / temperature
    sim_logits = sim - jnp.max(sim)
    sim_exp = jnp.exp(sim_logits)
    n = 2 * b
    eye_n = jnp.eye(n)
    pos_mask = jnp.tile(jnp.eye(b), (2, 2)) * (1.0 - eye_n)
    neg_mask = (1.0 - jnp.tile(jnp.eye(b), (2, 2))) * (1.0 - eye_n)
    pos = sim_exp * pos_mask
    negs = sim_exp * neg_mask
    pos_count = pos_mask.sum(1)
    if not out_mode:
        return jnp.mean(-jnp.log(pos.sum(1) / (pos.sum(1) + negs.sum(1))) / pos_count)
    denom = (pos + negs).sum(1, keepdims=True)
    per_row = ((sim_logits - jnp.log(denom)) * pos_mask).sum(1) / pos_count
    return -jnp.mean(per_row)


if __name__ == "__main__":
    key = jax.random.PRNGKey(0)

    def _make_inputs(k, batch, dim):
        k1, k2 = jax.random.split(k)
        f1 = jax.random.normal(k1, (batch, dim), dtype=jnp.float32)
        f2 = jax.random.normal(k2, (batch, dim), dtype=jnp.float32)
        # module asserts features are L2-normalized along dim=1
        f1 = f1 / jnp.linalg.norm(f1, axis=1, keepdims=True)
        f2 = f2 / jnp.linalg.norm(f2, axis=1, keepdims=True)
        return f1, f2

    for batch, dim in ((8, 32), (16, 128)):
        key, sub = jax.random.split(key)
        f1, f2 = _make_inputs(sub, batch, dim)

        loss = supcon_loss2(f1, f2, temperature=0.07, out_mode=True)
        loss = jax.block_until_ready(loss)
        assert jnp.isfinite(loss), f"loss is NaN/inf for batch={batch}, dim={dim}"

        ref_out = _reference_loss(f1, f2, temperature=0.07, out_mode=True)
        ref_in = _reference_loss(f1, f2, temperature=0.07, out_mode=False)
        assert jnp.allclose(loss, ref_out, rtol=1e-5, atol=1e-5), (batch, dim, loss, ref_out)
        assert jnp.allclose(loss, ref_in, rtol=1e-5, atol=1e-5), (batch, dim, loss, ref_in)

    print("KERNEL_OK")
</pallas_src>

<mosaic_0001>
module attributes {stable_mosaic.version = 11 : i64} {
  func.func @_supcon_tile_kernel(%arg0: i32, %arg1: i32, %arg2: memref<8x32xf32, #tpu.memory_space<vmem>>, %arg3: memref<8x32xf32, #tpu.memory_space<vmem>>, %arg4: memref<1x1x8xf32, #tpu.memory_space<vmem>>, %arg5: memref<1x8xf32, #tpu.memory_space<vmem>>, %arg6: memref<1x8xf32, #tpu.memory_space<vmem>>) attributes {dimension_semantics = [#tpu.dimension_semantics<parallel>, #tpu.dimension_semantics<arbitrary>], iteration_bounds = array<i64: 2, 2>, scalar_prefetch = 0 : i64, scratch_operands = 2 : i64, tpu.core_type = #tpu.core_type<tc>, window_params = [{transform_indices = @transform_0, window_bounds = array<i64: 8, 32>}, {transform_indices = @transform_1, window_bounds = array<i64: 8, 32>}, {transform_indices = @transform_2, window_bounds = array<i64: 1, 1, 8>}]} {
    %c0_i32 = arith.constant 0 : i32
    %0 = arith.cmpi eq, %arg1, %c0_i32 : i32
    %1 = arith.extui %0 : i1 to i32
    %c0_i32_0 = arith.constant 0 : i32
    %2 = arith.cmpi ne, %1, %c0_i32_0 : i32
    scf.if %2 {
      %cst_19 = arith.constant 0.000000e+00 : f32
      %39 = vector.broadcast %cst_19 : f32 to vector<1x8xf32>
      %c0_20 = arith.constant 0 : index
      %c0_21 = arith.constant 0 : index
      %40 = vector.load %arg5[%c0_20, %c0_21] : memref<1x8xf32, #tpu.memory_space<vmem>>, vector<1x8xf32>
      tpu.vector_store %arg5[%c0_20, %c0_21], %39 {strides = array<i32>} : memref<1x8xf32, #tpu.memory_space<vmem>>, vector<1x8xf32>,
      %cst_22 = arith.constant 0.000000e+00 : f32
      %41 = vector.broadcast %cst_22 : f32 to vector<1x8xf32>
      %c0_23 = arith.constant 0 : index
      %c0_24 = arith.constant 0 : index
      %42 = vector.load %arg6[%c0_23, %c0_24] : memref<1x8xf32, #tpu.memory_space<vmem>>, vector<1x8xf32>
      tpu.vector_store %arg6[%c0_23, %c0_24], %41 {strides = array<i32>} : memref<1x8xf32, #tpu.memory_space<vmem>>, vector<1x8xf32>,
    } else {
    }
    %c0 = arith.constant 0 : index
    %c0_1 = arith.constant 0 : index
    %3 = vector.load %arg2[%c0, %c0_1] : memref<8x32xf32, #tpu.memory_space<vmem>>, vector<8x32xf32>
    %c0_2 = arith.constant 0 : index
    %c0_3 = arith.constant 0 : index
    %4 = vector.load %arg3[%c0_2, %c0_3] : memref<8x32xf32, #tpu.memory_space<vmem>>, vector<8x32xf32>
    %cst = arith.constant dense<0.000000e+00> : vector<8x8xf32>
    %5 = tpu.matmul %4, %3, %cst {dimension_numbers = #tpu.dot_dimension_numbers<[1], [1], [0], [0], [0, 0, 1, 0], [], []>} : vector<8x32xf32>, vector<8x32xf32>, vector<8x8xf32> -> vector<8x8xf32>
    %cst_4 = arith.constant 14.2857141 : f32
    %6 = vector.broadcast %cst_4 : f32 to vector<8x8xf32>
    %7 = arith.subf %5, %6 : vector<8x8xf32>
    %8 = tpu.iota {dimensions = array<i32: 0>} : vector<8x8xi32>
    %9 = tpu.iota {dimensions = array<i32: 1>} : vector<8x8xi32>
    %10 = arith.cmpi eq, %8, %9 : vector<8x8xi32>
    %11 = math.exp %7 : vector<8x8xf32>
    %12 = arith.cmpi eq, %arg1, %arg0 : i32
    %13 = vector.broadcast %12 : i1 to vector<8x8xi1>
    %14 = arith.andi %10, %13 : vector<8x8xi1>
    %cst_5 = arith.constant 0.000000e+00 : f32
    %15 = vector.broadcast %cst_5 : f32 to vector<8x8xf32>
    %16 = arith.select %14, %15, %11 : vector<8x8xi1>, vector<8x8xf32>
    %c0_6 = arith.constant 0 : index
    %c0_7 = arith.constant 0 : index
    %17 = vector.load %arg5[%c0_6, %c0_7] : memref<1x8xf32, #tpu.memory_space<vmem>>, vector<1x8xf32>
    %cst_8 = arith.constant dense<0.000000e+00> : vector<8xf32>
    %18 = vector.multi_reduction <add>, %16, %cst_8 [0] : vector<8x8xf32> to vector<8xf32>
    %19 = vector.shape_cast %18 : vector<8xf32> to vector<1x8xf32>
    %20 = arith.addf %17, %19 : vector<1x8xf32>
    %c0_9 = arith.constant 0 : index
    %c0_10 = arith.constant 0 : index
    %21 = vector.load %arg5[%c0_9, %c0_10] : memref<1x8xf32, #tpu.memory_space<vmem>>, vector<1x8xf32>
    tpu.vector_store %arg5[%c0_9, %c0_10], %20 {strides = array<i32>} : memref<1x8xf32, #tpu.memory_space<vmem>>, vector<1x8xf32>,
    %c1_i32 = arith.constant 1 : i32
    %22 = arith.addi %arg0, %c1_i32 : i32
    %c2_i32 = arith.constant 2 : i32
    %c0_i32_11 = arith.constant 0 : i32
    %23 = arith.cmpi eq, %c2_i32, %c0_i32_11 : i32
    %c1_i32_12 = arith.constant 1 : i32
    %24 = arith.select %23, %c1_i32_12, %c2_i32 : i32
    %25 = arith.remsi %22, %24 : i32
    %c0_i32_13 = arith.constant 0 : i32
    %26 = arith.cmpi ne, %25, %c0_i32_13 : i32
    %c0_i32_14 = arith.constant 0 : i32
    %27 = arith.cmpi slt, %25, %c0_i32_14 : i32
    %c0_i32_15 = arith.constant 0 : i32
    %28 = arith.cmpi slt, %24, %c0_i32_15 : i32
    %29 = arith.xori %27, %28 : i1
    %30 = arith.andi %29, %26 : i1
    %31 = arith.addi %25, %24 : i32
    %32 = arith.select %30, %31, %25 : i32
    %33 = arith.cmpi eq, %arg1, %32 : i32
    %34 = arith.extui %33 : i1 to i32
    %c0_i32_16 = arith.constant 0 : i32
    %35 = arith.cmpi ne, %34, %c0_i32_16 : i32
    scf.if %35 {
      %cst_19 = arith.constant 0.000000e+00 : f32
      %39 = vector.broadcast %cst_19 : f32 to vector<8x8xf32>
      %40 = arith.select %10, %7, %39 : vector<8x8xi1>, vector<8x8xf32>
      %cst_20 = arith.constant dense<0.000000e+00> : vector<8xf32>
      %41 = vector.multi_reduction <add>, %40, %cst_20 [0] : vector<8x8xf32> to vector<8xf32>
      %42 = vector.shape_cast %41 : vector<8xf32> to vector<1x8xf32>
      %c0_21 = arith.constant 0 : index
      %c0_22 = arith.constant 0 : index
      %43 = vector.load %arg6[%c0_21, %c0_22] : memref<1x8xf32, #tpu.memory_space<vmem>>, vector<1x8xf32>
      tpu.vector_store %arg6[%c0_21, %c0_22], %42 {strides = array<i32>} : memref<1x8xf32, #tpu.memory_space<vmem>>, vector<1x8xf32>,
    } else {
    }
    %c1_i32_17 = arith.constant 1 : i32
    %36 = arith.cmpi eq, %arg1, %c1_i32_17 : i32
    %37 = arith.extui %36 : i1 to i32
    %c0_i32_18 = arith.constant 0 : i32
    %38 = arith.cmpi ne, %37, %c0_i32_18 : i32
    scf.if %38 {
      %c0_19 = arith.constant 0 : index
      %c0_20 = arith.constant 0 : index
      %39 = vector.load %arg6[%c0_19, %c0_20] : memref<1x8xf32, #tpu.memory_space<vmem>>, vector<1x8xf32>
      %c0_21 = arith.constant 0 : index
      %c0_22 = arith.constant 0 : index
      %40 = vector.load %arg5[%c0_21, %c0_22] : memref<1x8xf32, #tpu.memory_space<vmem>>, vector<1x8xf32>
      %41 = math.log %40 : vector<1x8xf32>
      %42 = arith.subf %39, %41 : vector<1x8xf32>
      %43 = vector.shape_cast %42 : vector<1x8xf32> to vector<1x1x8xf32>
      %c0_23 = arith.constant 0 : index
      %c0_24 = arith.constant 0 : index
      %c0_25 = arith.constant 0 : index
      %44 = vector.load %arg4[%c0_23, %c0_24, %c0_25] : memref<1x1x8xf32, #tpu.memory_space<vmem>>, vector<1x1x8xf32>
      tpu.vector_store %arg4[%c0_23, %c0_24, %c0_25], %43 {strides = array<i32>} : memref<1x1x8xf32, #tpu.memory_space<vmem>>, vector<1x1x8xf32>,
    } else {
    }
    return
  }
  func.func @transform_0(%arg0: i32, %arg1: i32) -> (i32, i32) {
    %c0_i32 = arith.constant 0 : i32
    %c0_i32_0 = arith.constant 0 : i32
    return %arg0, %c0_i32 : i32, i32
  }
  func.func @transform_1(%arg0: i32, %arg1: i32) -> (i32, i32) {
    %c0_i32 = arith.constant 0 : i32
    %c0_i32_0 = arith.constant 0 : i32
    return %arg1, %c0_i32 : i32, i32
  }
  func.func @transform_2(%arg0: i32, %arg1: i32) -> (i32, i32, i32) {
    %c0_i32 = arith.constant 0 : i32
    %c0_i32_0 = arith.constant 0 : i32
    %c0_i32_1 = arith.constant 0 : i32
    return %arg0, %c0_i32, %c0_i32_0 : i32, i32, i32
  }
}

</mosaic_0001>

<bundles_post_ra>
// kernel: tpu_custom_call.1
= control target key start
LH: loop header
LB: loop body
LE: loop exit
PB: predicated region body
PF: predicated region fallthrough
CT: control target
= control target key end

     0   :  { %s1139_s0 = inlined_call_operand.hbm [shape: f32[16,32], index: 0, kind: input, shape index: {}]   ;;  %s1140_s1 = inlined_call_operand.hbm [shape: f32[16,32], index: 1, kind: input, shape index: {}]   ;;  %s1141_s2 = inlined_call_operand.hbm [shape: f32[2,1,8], index: 2, kind: output, shape index: {}]  }
   0x1   :  { %1149 = sst [smem:[#allocation15_spill]] %s1139_s0 }
   0x2   :  { %7 = vsyncpa [#allocation5], 0 }
   0x3   :  { %9 = vsyncpa [#allocation5 + $0x1], 0 }
   0x4   :  { %10 = vsyncpa [#allocation8], 0 }
   0x5   :  { %12 = vsyncpa [#allocation8 + $0x1], 0 }
   0x6   :  { %13 = vsyncpa [#allocation6], 0 }
   0x7   :  { %15 = vsyncpa [#allocation6 + $0x1], 0  ;;  %s821_s9 = smov 0   ;;  %s823_s10 = smov 0  }
   0x8   :  { %s825_s11 = smov 0   ;;  %s827_s12 = smov 0  }
   0x9   :  { %s829_s13 = smov 0   ;;  %s831_s14 = smov 0  }
   0xa   :  { %s833_s15 = smov 0   ;;  %s835_s16 = smov 0  }
   0xb   :  { %s837_s17 = smov 0   ;;  %s839_s18 = smov 0  }
   0xc   :  { %s841_s19 = smov 0  }
   0xd LB: > { %s468_s20 = sadd.s32 4294967295, %s798_s19   ;;  %s469_s21 = sadd.s32 4294967294, %s798_s19   ;;  %s798_s19 = sphi %s841_s19, %s21_s19   ;;  %s794_s18 = sphi %s839_s18, %s1182_s18   ;;  %s790_s17 = sphi %s837_s17, %s1181_s17   ;;  %s786_s16 = sphi %s835_s16, %s1180_s16   ;;  %s782_s15 = sphi %s833_s15, %s1179_s15   ;;  %s778_s14 = sphi %s831_s14, %s1178_s14   ;;  %s774_s13 = sphi %s829_s13, %s1177_s13   ;;  %s770_s12 = sphi %s827_s12, %s1176_s12   ;;  %s766_s11 = sphi %s825_s11, %s1175_s11   ;;  %s762_s10 = sphi %s823_s10, %s1174_s10   ;;  %s758_s9 = sphi %s821_s9, %s1173_s9  }
   0xe   : > { %s33_s22 = sadd.s32 1, %s794_s18  ;;  %s40_s23 = sadd.s32 1, %s778_s14 }
   0xf   : > { %p47_p0 = scmp.ne.s32.totalorder %s778_s14, %s774_s13  ;;  %p1143_p1 = scmp.eq.s32.totalorder %s798_s19, 0 }
  0x10   : > { %p53_p2 = scmp.ne.s32.totalorder %s774_s13, %s770_s12  ;;  %p885_p3 = scmp.eq.s32.totalorder %s468_s20, 0 }
  0x11   : > { %p891_p4 = por %p1143_p1, %p47_p0  ;;  %p103_p5 = scmp.eq.s32.totalorder %s468_s20, 3 }
  0x12   : > { %p897_p6 = por %p885_p3, %p53_p2  ;;  %p109_p7 = scmp.eq.s32.totalorder %s469_s21, 3 }
  0x13   : > { %p901_p8 = por %p103_p5, %p47_p0  ;;  %p1142_p10 = scmp.lt.s32.totalorder %s798_s19, 4 }
  0x14   : > { %s1152_s26 = scalar_select %p897_p6, 1, 0 }
  0x15   : > { %s1153_s27 = scalar_select %p901_p8, 1, 0 }
  0x16   : > { %p905_p9 = por %p109_p7, %p53_p2  ;;  %s129_s29 = sand.u32 1, %s778_s14  }
  0x17   : > { %s473_s30 = sshll.u32 %s794_s18, 7  ;;  %s472_s3 = sshll.u32 %s129_s29, 3 }
  0x18   : > { %s1154_s28 = scalar_select %p905_p9, 1, 0 }
  0x19   : > { %s1156_s0 = sld [smem:[#allocation15_spill]]  ;;  %s133_s7 = scalar_lea.vmem [#allocation4], %s472_s3 }
  0x1a   : > { %1155 = sst [smem:[#allocation13_spill]] %s1154_s28  ;;  %s140_s8 = sshll.u32 %s133_s7, 4  ;;  %s925_s8 = int_to_ptr.vmem [resolvable:$true] %s140_s8 }
  0x1b   : > { %p921_p11 = pnand %p1142_p10, %p891_p4  ;;  %s130_s21 = scalar_lea.sflag [#allocation5], %s129_s29 }
  0x1d   : > { %p614_p2 = pneg %p921_p11 }
  0x1f   : > { %s915_s6 = scalar_lea.hbm %s1156_s0, %s473_s30  ;;  %s617_s4 = scalar_lea.hbm %s1156_s0, 256 }
  0x20   : > { %s612_s30 = scalar_lea.hbm %s915_s6, 128  ;;  %p618_p4 = scmp.lt.u32.totalorder %s915_s6, %s1156_s0 }
  0x21   : > { %p613_p0 = scmp.ne.s32.totalorder %s915_s6, %s612_s30  ;;  %p619_p10 = scmp.lt.u32.totalorder %s617_s4, %s612_s30 }
  0x22   : > { %p621_p12 = scmp.lt.u32.totalorder %s612_s30, %s915_s6 }
  0x23   : > { %p615_p5 = pnand %p614_p2, %p613_p0  ;;  %p620_p1 = por %p619_p10, %p618_p4 }
  0x25   : > { %p616_p7 = pneg %p615_p5  ;;  %p622_p13 = por %p621_p12, %p620_p1 }
  0x27   : > { %p623_p9 = pnand %p622_p13, %p616_p7 }
  0x29   : > { %626 = shalt.err (!%p623_p9)
}
  0x2a   : > { %s627_s29 = scalar_lea.vmem %s925_s8, 128  ;;  %s800_s25 = smov [#allocation4]  }
  0x2b   : > { %p628_p0 = scmp.ne.s32.totalorder %s925_s8, %s627_s29  ;;  %s632_s3 = sshll.u32 %s800_s25, 4  ;;  %s633_s3 = int_to_ptr.vmem [resolvable:$false] %s632_s3 }
  0x2c   : > { %s634_s5 = scalar_lea.vmem %s633_s3, 256  ;;  %p635_p6 = scmp.lt.s32.totalorder %s925_s8, %s633_s3 }
  0x2d   : > { %p630_p5 = pnand %p628_p0, %p614_p2  ;;  %p636_p10 = scmp.lt.s32.totalorder %s634_s5, %s627_s29 }
  0x2f   : > { %p631_p8 = pneg %p630_p5  ;;  %p637_p4 = por %p636_p10, %p635_p6 }
  0x31   : > { %p638_p1 = pnand %p637_p4, %p631_p8 }
  0x33   : > { %641 = shalt.err (!%p638_p1)
}
  0x34   : > { %507 = dma.hbm_to_vmem [thread:$0]  (!%p921_p11), %s915_s6, 128, %s925_s8, %s130_s21  }
  0x35   : > { %p1158_p6 = scmp.lt.s32.totalorder %s798_s19, 5  ;;  %p1159_p8 = scmp.ge.s32.totalorder %s798_s19, 1 }
  0x36   : > { %s30_s30 = sadd.s32 1, %s790_s17  ;;  %s66_s4 = sadd.s32 1, %s766_s11 }
  0x37   : > { %p958_p9 = pnand %p1159_p8, %p1158_p6  ;;  %p31_p12 = scmp.ge.s32.totalorder %s30_s30, 2 }
  0x38   : > { %p73_p13 = scmp.ne.s32.totalorder %s766_s11, %s762_s10  ;;  %p79_p2 = scmp.ne.s32.totalorder %s762_s10, %s758_s9 }
  0x39   : > { %s1184_s30 = smov (%p31_p12, %s30_s30), 0  ;;  %s1186_s22 = smov (!%p31_p12, %s33_s22), %s794_s18 }
  0x3a   : > { %1161 = sst [smem:[#allocation14_spill]] %s1184_s30  ;;  %s63_s6 = ssub.s32 %s790_s17, %s1184_s30 }
  0x3b   : > { %p1162_p11 = scmp.eq.s32.totalorder %s798_s19, 0  ;;  %p35_p0 = scmp.ge.s32.totalorder %s1186_s22, 2 }
  0x3c   : > { %p64_p5 = scmp.eq.s32.totalorder %s63_s6, 0  ;;  %p983_p10 = por %p79_p2, %p885_p3 }
  0x3d   : > { %p977_p7 = por %p73_p13, %p1162_p11  ;;  %s147_s9 = sand.u32 1, %s766_s11  }
  0x3e   : > { %s1164_s21 = scalar_select %p983_p10, 1, 0 }
  0x3f   : > { %s1188_s22 = smov (%p35_p0, %s1186_s22), 0  ;;  %s474_s25 = sshll.u32 %s147_s9, 3 }
  0x40   : > { %s991_s7 = scalar_select %p64_p5, %s766_s11, %s66_s4  }
  0x41   : > { %s37_s29 = ssub.s32 %s794_s18, %s1188_s22  ;;  %s475_s3 = sshll.u32 %s790_s17, 7 }
  0x42   : > { %p38_p4 = scmp.eq.s32.totalorder %s37_s29, 0  ;;  %s1004_s24 = scalar_lea.hbm %s1140_s1, %s475_s3 }
  0x43   : > { %s151_s30 = scalar_lea.vmem [#allocation7], %s474_s25  ;;  %p1165_p3 = scmp.lt.s32.totalorder %s798_s19, 4 }
  0x44   : > { %s999_s5 = scalar_select %p38_p4, %s778_s14, %s40_s23  }
  0x45   : > { %s158_s28 = sshll.u32 %s151_s30, 4  ;;  %p1012_p1 = pnand %p1165_p3, %p977_p7  ;;  %s1006_s28 = int_to_ptr.vmem [resolvable:$true] %s158_s28 }
  0x46   : > { %s148_s23 = scalar_lea.sflag [#allocation8], %s147_s9  ;;  %s642_s0 = scalar_lea.hbm %s1004_s24, 128 }
  0x47   : > { %p643_p6 = scmp.ne.s32.totalorder %s1004_s24, %s642_s0  ;;  %p644_p8 = pneg %p1012_p1 }
  0x48   : > { %s647_s8 = scalar_lea.hbm %s1140_s1, 256  ;;  %p648_p2 = scmp.lt.u32.totalorder %s1004_s24, %s1140_s1 }
  0x49   : > { %p645_p12 = pnand %p644_p8, %p643_p6  ;;  %p649_p11 = scmp.lt.u32.totalorder %s647_s8, %s642_s0 }
  0x4a   : > { %p651_p0 = scmp.lt.u32.totalorder %s642_s0, %s1004_s24 }
  0x4b   : > { %p646_p13 = pneg %p645_p12  ;;  %p650_p7 = por %p649_p11, %p648_p2 }
  0x4d   : > { %p652_p5 = por %p651_p0, %p650_p7 }
  0x4f   : > { %p653_p4 = pnand %p652_p5, %p646_p13 }
  0x51   : > { %656 = shalt.err (!%p653_p4)
}
  0x52   : > { %s657_s9 = scalar_lea.vmem %s1006_s28, 128  ;;  %s801_s6 = smov [#allocation7]  }
  0x53   : > { %p658_p3 = scmp.ne.s32.totalorder %s1006_s28, %s657_s9  ;;  %s662_s30 = sshll.u32 %s801_s6, 4  ;;  %s663_s30 = int_to_ptr.vmem [resolvable:$false] %s662_s30 }
  0x54   : > { %s664_s29 = scalar_lea.vmem %s663_s30, 256  ;;  %p665_p10 = scmp.lt.s32.totalorder %s1006_s28, %s663_s30 }
  0x55   : > { %p660_p6 = pnand %p658_p3, %p644_p8  ;;  %p666_p2 = scmp.lt.s32.totalorder %s664_s29, %s657_s9 }
  0x57   : > { %p661_p12 = pneg %p660_p6  ;;  %p667_p11 = por %p666_p2, %p665_p10 }
  0x59   : > { %p668_p7 = pnand %p667_p11, %p661_p12 }
  0x5b   : > { %671 = shalt.err (!%p668_p7)
}
  0x5c   : > { %510 = dma.hbm_to_vmem [thread:$0]  (!%p1012_p1), %s1004_s24, 128, %s1006_s28, %s148_s23  }
  0x5d   : > { %167 = sbr.rel (%p958_p9) target bundleno = 411 (0x19b), region = 28  ;;  %s1044_s0 = sand.u32 (!%p958_p9), 1, %s774_s13  }
  0x5e   : > { %s477_s8 = sshll.u32 (!%p958_p9), %s1044_s0, 3  ;;  %s170_s25 = scalar_lea.sflag (!%p958_p9), [#allocation5], %s1044_s0 }
  0x5f   : > { %s173_s3 = scalar_lea.vmem (!%p958_p9), [#allocation4], %s477_s8  ;;  %p1167_p10 = scmp.ne.s32.totalorder (!%p958_p9), %s1152_s26, 0 }
  0x64   : > { %745 = dma.done.wait (%p1167_p10), %s170_s25, 128  }
  0x65   : > { %747 = vsyncadd (%p1167_p10), %s170_s25, 4294967168  ;;  %s178_s28 = sand.u32 1, %s762_s10   ;;  %p1168_p9 = scmp.ne.s32.totalorder %s1164_s21, 0 }
  0x66   : > { %s478_s24 = sshll.u32 %s178_s28, 3  ;;  %s179_s20 = scalar_lea.sflag [#allocation8], %s178_s28 }
  0x67   : > { %s182_s4 = scalar_lea.vmem [#allocation7], %s478_s24 }
  0x68   : > { %749 = dma.done.wait (%p1168_p9), %s179_s20, 128  }
  0x69   : > { %751 = vsyncadd (%p1168_p9), %s179_s20, 4294967168  ;;  %s206_s23 = scalar_lea.vmem [#allocation9], %s1044_s0  ;;  %p479_p1 = scmp.ne.s32.totalorder %s782_s15, 0 }
  0x6a   : > { %vm211_vm0 = vcmask (!%p479_p1), 57344   ;;  %v802_v0 = vmov (!%p479_p1), 0.0  }
  0x6b   : > { %210 = sbr.rel (%p479_p1) target bundleno = 114 (0x72), region = 40  ;;  %212 = vst.msk [vmem:[#allocation2] sm:$0x1] (!%p479_p1), %vm211_vm0, %v802_v0  ;;  %213 = vst.msk [vmem:[#allocation3] sm:$0x1] (!%p479_p1), %vm211_vm0, %v802_v0 }
  0x72 PF: > { %v214_v1 = vld [vmem:[%s173_s3] sm:$0xff]  ;;  %vm216_vm1 = vcmask 261120   ;;  %v803_v2 = vmov 0.0   ;;  %vm804_vm2 = vmmov 0   ;;  %v215_v3 = vld [vmem:[%s182_s4] sm:$0xff]  ;;  %s319_s26 = sadd.s32 1, %s786_s16  ;;  %p301_p0 = scmp.eq.s32.totalorder %s782_s15, %s786_s16  ;;  %v294_v7 = vlaneseq }
  0x73   : > { %493 = vmatprep.subr.mxu0 %v803_v2  ;;  %495 = vmatprep.mubr.msk.f32.mxu0 %vm804_vm2, %v803_v2  ;;  %s321_s21 = ssub.s32 0, %s319_s26  ;;  %p320_p8 = scmp.lt.s32.totalorder %s319_s26, 0  ;;  %vm308_vm6 = vcmask 64512   ;;  %v307_v20 = vld [vmem:[#allocation2] sm:$0x1]  ;;  %vm317_vm7 = vcmask 57344  }
  0x74   : > { %494 = vmatpush3.xpose.msk.msra.mxu0 %vm216_vm1, %v214_v1  ;;  %s483_s9 = smin.u32 %s321_s21, %s319_s26  ;;  %v295_v9 = vshrl.u32 %v294_v7, 7  ;;  %v297_v10 = vand.u32 127, %v294_v7 }
  0x75   : > { %s323_s6 = sand.u32 1, %s483_s9  }
  0x76   : > { %s324_s30 = ssub.s32 0, %s323_s6  ;;  %vm298_vm3 = vcmp.eq.s32.totalorder %v295_v9, %v297_v10 }
  0x77   : > { %496 = vmatmul.mubr.msk.f32.vlgmr.msra.gmra.mrb[0].mxu0 %vm216_vm1, %v215_v3  ;;  %s1190_s30 = smov (!%p320_p8, %s324_s30), %s323_s6 }
  0x78   : > { %p485_p13 = scmp.lt.s32.totalorder %s1190_s30, 0  ;;  %s330_s29 = sadd.s32 2, %s1190_s30 }
  0x79   : > { %s302_s8 = scalar_select %p301_p0, 1, 0 }
  0x7a   : > { %s1192_s29 = smov (!%p485_p13, %s330_s29), %s1190_s30 }
  0x7b   : > { %v303_v11 = vstv %s302_s8  ;;  %p486_p5 = scmp.ne.s32.totalorder %s782_s15, %s1192_s29 }
  0x7c   : > { %vm304_vm4 = vcmp.eq.s32.totalorder %v303_v11, 1 }
  0x7d   : > { %vm305_vm5 = vmand %vm298_vm3, %vm304_vm4 }
 0x14a   : > { %v289_v4 = vpop.f32.mrb[0].mxu0 }
 0x14b   : > { %v482_v5 = vadd.f32 -14.285714, %v289_v4  ;;  %v497_v6 = vpop.f32.mrb[1].mxu0 }
 0x14d   : > { %v299_v8 = vmul.f32 1.442695, %v482_v5  ;;  %v336_v23 = vsel (!%p486_p5), %vm298_vm3, %v482_v5, 0.0 }
 0x14e   : > { %v337_v24 = vsel (!%p486_p5), %vm308_vm6, %v336_v23, 0.0 }
 0x14f   : > { %608 = vpow2.f32 %v299_v8  ;;  %v338_v25 = vrot.slane (!%p486_p5), %v337_v24, 4 }
 0x151   : > { %v339_v26 = vadd.f32 (!%p486_p5), %v338_v25, %v337_v24 }
 0x153   : > { %v340_v27 = vrot.slane (!%p486_p5), %v339_v26, 2 }
 0x155   : > { %v341_v28 = vadd.f32 (!%p486_p5), %v340_v27, %v339_v26 }
 0x157   : > { %v342_v29 = vrot.slane (!%p486_p5), %v341_v28, 1 }
 0x159   : > { %v609_v12 = vpop.eup %608  ;;  %v343_v30 = vadd.f32 (!%p486_p5), %v342_v29, %v341_v28 }
 0x15a   : > { %v306_v13 = vsel %vm305_vm5, 0.0, %v609_v12 }
 0x15b   : > { %v309_v14 = vsel %vm308_vm6, %v306_v13, 0.0  ;;  %344 = vst.msk [vmem:[#allocation3] sm:$0x1] (!%p486_p5), %vm317_vm7, %v343_v30 }
 0x15c   : > { %v310_v15 = vrot.slane %v309_v14, 4 }
 0x15e   : > { %v311_v16 = vadd.f32 %v310_v15, %v309_v14 }
 0x160   : > { %v312_v17 = vrot.slane %v311_v16, 2 }
 0x162   : > { %v313_v18 = vadd.f32 %v312_v17, %v311_v16 }
 0x164   : > { %v314_v19 = vrot.slane %v313_v18, 1  ;;  %335 = sbr.rel (%p486_p5) target bundleno = 363 (0x16b), region = 44 }
 0x166   : > { %v315_v21 = vadd.f32 %v314_v19, %v313_v18 }
 0x168   : > { %v316_v22 = vadd.f32 %v315_v21, %v307_v20 }
 0x16a   : > { %318 = vst.msk [vmem:[#allocation2] sm:$0x1] %vm317_vm7, %v316_v22 }
 0x16b PF: > { %p487_p4 = scmp.ne.s32.totalorder %s782_s15, 1 }
 0x16c   : > { %v349_v33 = vld [vmem:[#allocation3] sm:$0x1] (!%p487_p4) }
 0x16d   : > { %348 = sbr.rel (%p487_p4) target bundleno = 386 (0x182), region = 48 }
 0x171   : > { %v350_v31 = vld [vmem:[#allocation2] sm:$0x1] (!%p487_p4) }
 0x172   : > { %610 = vlog2.f32 (!%p487_p4), %v350_v31 }
 0x17c   : > { %v611_v32 = vpop.eup %610 }
 0x17d   : > { %v352_v34 = vmul.f32 0.6931472, %v611_v32 }
 0x17f   : > { %v353_v35 = vsub.f32 %v349_v33, %v352_v34 }
 0x181   : > { %354 = vst.msk [vmem:[%s206_s23] sm:$0x1] %vm317_vm7, %v353_v35 }
 0x182 PF: > { %s488_s25 = sshll.u32 %s786_s16, 4  ;;  %s368_s24 = sshll.u32 %s206_s23, 4  ;;  %s369_s24 = int_to_ptr.vmem [resolvable:$true] %s368_s24 }
 0x183   : > { %s1080_s15 = scalar_lea.hbm %s1141_s2, %s488_s25  ;;  %s356_s20 = scalar_lea.sflag [#allocation6], %s1044_s0 }
 0x184   : > { %s672_s4 = scalar_lea.vmem %s369_s24, 16  ;;  %p1169_p6 = scmp.ne.s32.totalorder %s1153_s27, 0 }
 0x185   : > { %p673_p3 = scmp.ne.s32.totalorder %s369_s24, %s672_s4  ;;  %s805_s26 = smov [#allocation9]  }
 0x186   : > { %s676_s21 = sshll.u32 %s805_s26, 4  ;;  %s677_s21 = int_to_ptr.vmem [resolvable:$false] %s676_s21 }
 0x187   : > { %p674_p12 = pnand %p673_p3, %p1169_p6  ;;  %s678_s9 = scalar_lea.vmem %s677_s21, 32 }
 0x188   : > { %p679_p11 = scmp.lt.s32.totalorder %s369_s24, %s677_s21  ;;  %p680_p7 = scmp.lt.s32.totalorder %s678_s9, %s672_s4 }
 0x189   : > { %p675_p2 = pneg %p674_p12 }
 0x18a   : > { %p681_p10 = por %p680_p7, %p679_p11 }
 0x18c   : > { %p682_p9 = pnand %p681_p10, %p675_p2 }
 0x18e   : > { %685 = shalt.err (!%p682_p9)
}
 0x18f   : > { %s686_s16 = scalar_lea.hbm %s1080_s15, 16  ;;  %s690_s6 = scalar_lea.hbm %s1141_s2, 32 }
 0x190   : > { %p687_p1 = scmp.ne.s32.totalorder %s1080_s15, %s686_s16  ;;  %p691_p0 = scmp.lt.u32.totalorder %s1080_s15, %s1141_s2 }
 0x191   : > { %p692_p5 = scmp.lt.u32.totalorder %s690_s6, %s686_s16  ;;  %p694_p3 = scmp.lt.u32.totalorder %s686_s16, %s1080_s15 }
 0x192   : > { %p688_p8 = pnand %p687_p1, %p1169_p6 }
 0x193   : > { %p693_p4 = por %p692_p5, %p691_p0 }
 0x194   : > { %p689_p13 = pneg %p688_p8 }
 0x195   : > { %p695_p12 = por %p694_p3, %p693_p4 }
 0x197   : > { %p696_p2 = pnand %p695_p12, %p689_p13 }
 0x199   : > { %699 = shalt.err (!%p696_p2)
}
 0x19a   : > { %502 = dma.vmem_to_hbm [thread:$0]  (%p1169_p6), %s369_s24, 16, %s1080_s15, %s356_s20  }
 0x19b PF: > { %s1170_s8 = sld [smem:[#allocation13_spill]]  ;;  %p516_p11 = scmp.ge.s32.totalorder %s798_s19, 2 }
 0x19c   : > { %s380_s25 = sand.u32 1, %s770_s12  }
 0x19d   : > { %s381_s3 = scalar_lea.sflag [#allocation6], %s380_s25 }
 0x1a1   : > { %p1171_p7 = scmp.ne.s32.totalorder %s1170_s8, 0 }
 0x1a3   : > { %p512_p10 = pnand %p516_p11, %p1171_p7 }
 0x1a5   : > { %753 = dma.done.wait (!%p512_p10), %s381_s3, 16  }
 0x1a6   : > { %755 = vsyncadd (!%p512_p10), %s381_s3, 4294967280  ;;  %s21_s19 = sadd.s32 1, %s798_s19   ;;  %s1172_s27 = sld [smem:[#allocation14_spill]] }
 0x1a7   : > { %p18_p9 = scmp.ge.s32.totalorder %s21_s19, 6   ;;  %s1173_s9 = smov %s762_s10 }
 0x1a8   : > { %s1174_s10 = smov %s766_s11  ;;  %s1175_s11 = smov %s991_s7 }
 0x1a9   : > { %s1176_s12 = smov %s774_s13  ;;  %s1177_s13 = smov %s778_s14 }
 0x1aa   : > { %s1178_s14 = smov %s999_s5  ;;  %s1179_s15 = smov %s790_s17 }
 0x1ab   : > { %s1180_s16 = smov %s794_s18  ;;  %s1182_s18 = smov %s1188_s22 }
 0x1ac   : > { %s1181_s17 = smov %s1172_s27  ;;  %20 = sbr.rel (!%p18_p9) target bundleno = 13 (0xd), region = 98 }
 0x1b3   :  { %385 = vsyncpa [#allocation5], 1 }
 0x1b4   :  { %387 = vsyncpa [#allocation5 + $0x1], 1 }
 0x1b5   :  { %388 = vsyncpa [#allocation8], 1 }
 0x1b6   :  { %390 = vsyncpa [#allocation8 + $0x1], 1 }
 0x1b7   :  { %391 = vsyncpa [#allocation6], 1 }
 0x1b8   :  { %393 = vsyncpa [#allocation6 + $0x1], 1 }

</bundles_post_ra>
